<compile_context>
chip_gen: v7x
topology: tpu7x:2x2x1
jax: 0.10.0
libtpu: 0.0.40
codegen_flags: <defaults>
</compile_context>

<pallas_src>
import functools
import math

import jax
import jax.numpy as jnp
from jax import lax
from jax.experimental import pallas as pl
from jax.experimental.pallas import tpu as pltpu

_LANE = 128
_SUBLANE = 8


def _round_up(x: int, m: int) -> int:
    return (x + m - 1) // m * m


def _gelu(h, approximate: bool):
    if approximate:
        # tanh-approximate GELU runs on the EUP (separate VLIW slot).
        return jax.nn.gelu(h, approximate=True)
    # Exact erf GELU (matches torch.nn.GELU() default).
    return 0.5 * h * (1.0 + lax.erf(h * (1.0 / math.sqrt(2.0))))


# ----------------------------------------------------------------------------
# Kernels
# ----------------------------------------------------------------------------
def _ffn_kernel_resident(x_ref, w1_ref, b1_ref, w2_ref, b2_ref, o_ref,
                         *, approximate_gelu: bool):
    # x_ref: (TM, dm_p); w1: (dm_p, dh_p) bf16; b1: (1, dh_p) f32
    # w2: (dh_p, dm_p) bf16; b2: (1, dm_p) f32
    x = x_ref[...].astype(w1_ref.dtype)                       # bf16 for the MXU
    h = jnp.dot(x, w1_ref[...], preferred_element_type=jnp.float32) + b1_ref[...]
    h = _gelu(h, approximate_gelu).astype(w2_ref.dtype)
    y = jnp.dot(h, w2_ref[...], preferred_element_type=jnp.float32) + b2_ref[...]
    o_ref[...] = y.astype(o_ref.dtype)


def _ffn_kernel_stream(x_ref, w1_ref, b1_ref, w2_ref, b2_ref, o_ref, acc_ref,
                       *, approximate_gelu: bool):
    # Hidden dim streamed in chunks along grid axis 1 (reduction, "arbitrary").
    j = pl.program_id(1)

    @pl.when(j == 0)
    def _():
        acc_ref[...] = jnp.zeros_like(acc_ref)

    x = x_ref[...].astype(w1_ref.dtype)
    h = jnp.dot(x, w1_ref[...], preferred_element_type=jnp.float32) + b1_ref[...]
    h = _gelu(h, approximate_gelu).astype(w2_ref.dtype)
    acc_ref[...] += jnp.dot(h, w2_ref[...], preferred_element_type=jnp.float32)

    @pl.when(j == pl.num_programs(1) - 1)
    def _():
        o_ref[...] = (acc_ref[...] + b2_ref[...]).astype(o_ref.dtype)


# ----------------------------------------------------------------------------
# Planning (generation-aware VMEM budget, residency vs hidden-dim streaming)
# ----------------------------------------------------------------------------
def _vmem_capacity_bytes() -> int:
    try:
        cap = int(pltpu.get_tpu_info().vmem_capacity_bytes)
        if cap > 0:
            return cap
    except Exception:
        pass
    return 64 << 20  # conservative default (v7x per-core VMEM)


def _make_plan(d_model: int, d_hidden: int, hidden_block=None):
    w_bytes = 2  # bf16 weights
    vmem_cap = _vmem_capacity_bytes()
    budget = (vmem_cap * 85) // 100  # headroom for compiler internal scratch
    dm_p = _round_up(d_model, _LANE)
    dh_p = _round_up(d_hidden, _LANE)

    if hidden_block is not None:  # manual / testing hook
        tdh = _round_up(hidden_block, _LANE)
        dh_p = _round_up(d_hidden, tdh)
        return dict(dm_p=dm_p, dh_p=dh_p, tdh=tdh, resident=(tdh == dh_p),
                    budget=budget, vmem_cap=vmem_cap)

    resident_w = 2 * dm_p * dh_p * w_bytes + (dh_p + dm_p) * 4  # single-buffered
    if resident_w <= budget // 2:
        return dict(dm_p=dm_p, dh_p=dh_p, tdh=dh_p, resident=True,
                    budget=budget, vmem_cap=vmem_cap)

    # Weights too large to keep resident: stream the hidden dim. Per-chunk
    # double-buffered (dm_p, tdh) + (tdh, dm_p) bf16 weights target ~budget/2.
    tdh = (budget // 2) // (2 * 2 * dm_p * w_bytes)
    tdh = max(256, (tdh // 256) * 256)           # >=256-deep K for v6e/v7x MXU
    tdh = min(tdh, _round_up(d_hidden, 256))
    dh_p = _round_up(d_hidden, tdh)
    return dict(dm_p=dm_p, dh_p=dh_p, tdh=tdh, resident=(tdh == dh_p),
                budget=budget, vmem_cap=vmem_cap)


def _choose_row_tile(n, plan, x_bytes, out_bytes, single_buffer_weights):
    dm_p, dh_p, tdh = plan["dm_p"], plan["dh_p"], plan["tdh"]
    w_bytes = 2
    if plan["resident"]:
        nbuf = 1 if single_buffer_weights else 2
        fixed = nbuf * (2 * dm_p * dh_p * w_bytes + (dh_p + dm_p) * 4)
    else:
        nbuf_b2 = 1 if single_buffer_weights else 2
        fixed = 2 * (2 * dm_p * tdh * w_bytes + tdh * 4) + nbuf_b2 * dm_p * 4

    # Per-row residency: pipelined x/out tiles + live in-body intermediates.
    per_row = (2 * dm_p * x_bytes          # double-buffered x tile
               + 2 * dm_p * out_bytes      # double-buffered output tile
               + dm_p * w_bytes            # in-kernel bf16 copy of x
               + tdh * 4 + tdh * w_bytes   # f32 hidden activation + bf16 cast
               + dm_p * 4)                 # f32 result / accumulator

    avail = max(plan["budget"] - fixed, per_row * _SUBLANE)
    tm = (avail // per_row) // _SUBLANE * _SUBLANE
    tm = max(_SUBLANE, min(1024, tm))
    # Keep >=2 row steps so the "parallel" row axis can split across TensorCores.
    tm = min(tm, max(_SUBLANE, _round_up(pl.cdiv(n, 2), _SUBLANE)))
    return tm, fixed, per_row


# ----------------------------------------------------------------------------
# Wrapper
# ----------------------------------------------------------------------------
def make_ffn(w1, b1, w2, b2, *, out_dtype=None, approximate_gelu=False,
             hidden_block=None):
    """Prepare parameters once and return a fused FeedForward callable.

    w1: (d_model, d_hidden) -- transpose of torch's Linear weight
    b1: (d_hidden,) or (1, d_hidden)
    w2: (d_hidden, d_model)
    b2: (d_model,) or (1, d_model)
    out_dtype: output dtype (default: same as x; pass jnp.bfloat16 to halve
               output store traffic).
    """
    d_model, d_hidden = w1.shape
    assert w2.shape == (d_hidden, d_model)
    plan = _make_plan(d_model, d_hidden, hidden_block=hidden_block)
    dm_p, dh_p = plan["dm_p"], plan["dh_p"]

    # One-time parameter prep (cast + lane padding): per-call HBM traffic is
    # then only the activation stream.
    w1p = jnp.pad(w1.astype(jnp.bfloat16),
                  ((0, dm_p - d_model), (0, dh_p - d_hidden)))
    w2p = jnp.pad(w2.astype(jnp.bfloat16),
                  ((0, dh_p - d_hidden), (0, dm_p - d_model)))
    b1p = jnp.pad(b1.reshape(1, d_hidden).astype(jnp.float32),
                  ((0, 0), (0, dh_p - d_hidden)))
    b2p = jnp.pad(b2.reshape(1, d_model).astype(jnp.float32),
                  ((0, 0), (0, dm_p - d_model)))
    params = (w1p, b1p, w2p, b2p)

    def forward(x):
        return _feed_forward(x, params, plan, d_model, out_dtype, approximate_gelu)

    return forward


def _feed_forward(x, params, plan, d_model, out_dtype, approximate_gelu):
    w1p, b1p, w2p, b2p = params
    batch, seq, _ = x.shape
    n = batch * seq
    dm_p, dh_p, tdh = plan["dm_p"], plan["dh_p"], plan["tdh"]
    o_dtype = x.dtype if out_dtype is None else jnp.dtype(out_dtype)

    x2d = x.reshape(n, d_model)
    if dm_p != d_model:
        # Lane-pad (and fold in the bf16 cast) only when d_model isn't 128-aligned.
        x2d = jnp.pad(x2d, ((0, 0), (0, dm_p - d_model))).astype(jnp.bfloat16)
    x_bytes = x2d.dtype.itemsize
    out_bytes = jnp.dtype(o_dtype).itemsize

    def build_and_run(single_buffer_weights):
        tm, fixed, per_row = _choose_row_tile(n, plan, x_bytes, out_bytes,
                                              single_buffer_weights)
        est = fixed + tm * per_row
        vmem_limit = int(min(plan["vmem_cap"] * 92 // 100,
                             max(est * 14 // 10, 32 << 20)))

        def const_spec(shape, index_map):
            # Constant-index inputs: single buffer (no re-DMA, half the VMEM).
            if single_buffer_weights:
                return pl.BlockSpec(shape, index_map, pipeline_mode=pl.Buffered(1))
            return pl.BlockSpec(shape, index_map)

        if plan["resident"]:
            grid = (pl.cdiv(n, tm),)
            kernel = functools.partial(_ffn_kernel_resident,
                                       approximate_gelu=approximate_gelu)
            in_specs = [
                pl.BlockSpec((tm, dm_p), lambda i: (i, 0)),       # x stream
                const_spec((dm_p, dh_p), lambda i: (0, 0)),       # w1 resident
                const_spec((1, dh_p), lambda i: (0, 0)),          # b1 resident
                const_spec((dh_p, dm_p), lambda i: (0, 0)),       # w2 resident
                const_spec((1, dm_p), lambda i: (0, 0)),          # b2 resident
            ]
            out_specs = pl.BlockSpec((tm, dm_p), lambda i: (i, 0))
            scratch_shapes = []
            dim_sem = ("parallel",)
        else:
            grid = (pl.cdiv(n, tm), dh_p // tdh)
            kernel = functools.partial(_ffn_kernel_stream,
                                       approximate_gelu=approximate_gelu)
            in_specs = [
                pl.BlockSpec((tm, dm_p), lambda i, j: (i, 0)),    # x (const in j)
                pl.BlockSpec((dm_p, tdh), lambda i, j: (0, j)),   # w1 chunk
                pl.BlockSpec((1, tdh), lambda i, j: (0, j)),      # b1 chunk
                pl.BlockSpec((tdh, dm_p), lambda i, j: (j, 0)),   # w2 chunk
                const_spec((1, dm_p), lambda i, j: (0, 0)),       # b2 resident
            ]
            out_specs = pl.BlockSpec((tm, dm_p), lambda i, j: (i, 0))
            scratch_shapes = [pltpu.VMEM((tm, dm_p), jnp.float32)]
            dim_sem = ("parallel", "arbitrary")

        return pl.pallas_call(
            kernel,
            out_shape=jax.ShapeDtypeStruct((n, dm_p), o_dtype),
            grid=grid,
            in_specs=in_specs,
            out_specs=out_specs,
            scratch_shapes=scratch_shapes,
            compiler_params=pltpu.CompilerParams(
                dimension_semantics=dim_sem,
                vmem_limit_bytes=vmem_limit,
            ),
        )(x2d, w1p, b1p, w2p, b2p)

    try:
        out = build_and_run(True)
    except Exception:
        # Fallback if this JAX build rejects single-buffered constant inputs.
        out = build_and_run(False)

    if dm_p != d_model:
        out = out[:, :d_model]
    return out.reshape(batch, seq, d_model)


# ----------------------------------------------------------------------------
# Reference + self-test
# ----------------------------------------------------------------------------
def _ref_feed_forward(x, w1, b1, w2, b2):
    h = jnp.einsum("bsd,dh->bsh", x, w1) + b1.reshape(-1)
    h = 0.5 * h * (1.0 + lax.erf(h / jnp.sqrt(2.0)))
    return jnp.einsum("bsh,hd->bsd", h, w2) + b2.reshape(-1)


def _make_params(key, d_model, d_hidden):
    k1, kb1, k2, kb2 = jax.random.split(key, 4)
    bound1 = 1.0 / math.sqrt(d_model)
    w1 = jax.random.uniform(k1, (d_model, d_hidden), jnp.float32, -bound1, bound1)
    b1 = jax.random.uniform(kb1, (1, d_hidden), jnp.float32, -bound1, bound1)
    bound2 = 1.0 / math.sqrt(d_hidden)
    w2 = jax.random.uniform(k2, (d_hidden, d_model), jnp.float32, -bound2, bound2)
    b2 = jax.random.uniform(kb2, (1, d_model), jnp.float32, -bound2, bound2)
    return w1, b1, w2, b2


if __name__ == "__main__":
    key = jax.random.PRNGKey(0)
    kx1, kp1, kx2, kp2 = jax.random.split(key, 4)

    # Test 1: small shapes (padded-lane, weight-resident path).
    batch, seq, d_model, d_hidden = 2, 8, 32, 64
    x = jax.random.normal(kx1, (batch, seq, d_model), dtype=jnp.float32)
    w1, b1, w2, b2 = _make_params(kp1, d_model, d_hidden)
    y = make_ffn(w1, b1, w2, b2)(x)
    jax.block_until_ready(y)
    y_ref = _ref_feed_forward(x, w1, b1, w2, b2)
    assert y.shape == (batch, seq, d_model)
    # bf16 MXU inputs with f32 accumulation -> loosened tolerance vs f32 ref.
    assert jnp.allclose(y, y_ref, atol=2e-2, rtol=2e-2), "resident path mismatch"

    # Test 2: 128-aligned d_model (no activation pad/slice) + forced
    # hidden-dim streaming path (accumulator kernel, 2 hidden chunks).
    batch, seq, d_model, d_hidden = 2, 8, 128, 256
    x = jax.random.normal(kx2, (batch, seq, d_model), dtype=jnp.float32)
    w1, b1, w2, b2 = _make_params(kp2, d_model, d_hidden)
    y = make_ffn(w1, b1, w2, b2, hidden_block=128)(x)
    jax.block_until_ready(y)
    y_ref = _ref_feed_forward(x, w1, b1, w2, b2)
    assert y.shape == (batch, seq, d_model)
    assert jnp.allclose(y, y_ref, atol=2e-2, rtol=2e-2), "streaming path mismatch"

    print("KERNEL_OK")
</pallas_src>

<mosaic_0001>
module attributes {stable_mosaic.version = 11 : i64} {
  func.func @_ffn_kernel_resident(%arg0: i32, %arg1: memref<8x128xbf16, #tpu.memory_space<vmem>>, %arg2: memref<128x128xbf16, #tpu.memory_space<vmem>>, %arg3: memref<1x128xf32, #tpu.memory_space<vmem>>, %arg4: memref<128x128xbf16, #tpu.memory_space<vmem>>, %arg5: memref<1x128xf32, #tpu.memory_space<vmem>>, %arg6: memref<8x128xf32, #tpu.memory_space<vmem>>) attributes {dimension_semantics = [#tpu.dimension_semantics<parallel>], iteration_bounds = array<i64: 2>, scalar_prefetch = 0 : i64, scratch_operands = 0 : i64, tpu.core_type = #tpu.core_type<tc>, window_params = [{transform_indices = @transform_0, window_bounds = array<i64: 8, 128>}, {pipeline_mode = #tpu.pipeline_mode<synchronous>, transform_indices = @transform_1, window_bounds = array<i64: 128, 128>}, {pipeline_mode = #tpu.pipeline_mode<synchronous>, transform_indices = @transform_2, window_bounds = array<i64: 1, 128>}, {pipeline_mode = #tpu.pipeline_mode<synchronous>, transform_indices = @transform_3, window_bounds = array<i64: 128, 128>}, {pipeline_mode = #tpu.pipeline_mode<synchronous>, transform_indices = @transform_4, window_bounds = array<i64: 1, 128>}, {transform_indices = @transform_5, window_bounds = array<i64: 8, 128>}]} {
    %c0 = arith.constant 0 : index
    %c0_0 = arith.constant 0 : index
    %0 = vector.load %arg1[%c0, %c0_0] : memref<8x128xbf16, #tpu.memory_space<vmem>>, vector<8x128xbf16>
    %c0_1 = arith.constant 0 : index
    %c0_2 = arith.constant 0 : index
    %1 = vector.load %arg2[%c0_1, %c0_2] : memref<128x128xbf16, #tpu.memory_space<vmem>>, vector<128x128xbf16>
    %cst = arith.constant dense<0.000000e+00> : vector<8x128xf32>
    %2 = tpu.matmul %0, %1, %cst {dimension_numbers = #tpu.dot_dimension_numbers<[1], [0], [0], [1], [0, 0, 1, 1], [], []>} : vector<8x128xbf16>, vector<128x128xbf16>, vector<8x128xf32> -> vector<8x128xf32>
    %c0_3 = arith.constant 0 : index
    %c0_4 = arith.constant 0 : index
    %3 = vector.load %arg3[%c0_3, %c0_4] : memref<1x128xf32, #tpu.memory_space<vmem>>, vector<1x128xf32>
    %4 = vector.broadcast %3 : vector<1x128xf32> to vector<8x128xf32>
    %5 = arith.addf %2, %4 : vector<8x128xf32>
    %cst_5 = arith.constant 5.000000e-01 : f32
    %6 = vector.broadcast %cst_5 : f32 to vector<8x128xf32>
    %7 = arith.mulf %6, %5 : vector<8x128xf32>
    %cst_6 = arith.constant 0.707106769 : f32
    %8 = vector.broadcast %cst_6 : f32 to vector<8x128xf32>
    %9 = arith.mulf %5, %8 : vector<8x128xf32>
    %10 = math.erf %9 : vector<8x128xf32>
    %cst_7 = arith.constant 1.000000e+00 : f32
    %11 = vector.broadcast %cst_7 : f32 to vector<8x128xf32>
    %12 = arith.addf %11, %10 : vector<8x128xf32>
    %13 = arith.mulf %7, %12 : vector<8x128xf32>
    %14 = arith.truncf %13 : vector<8x128xf32> to vector<8x128xbf16>
    %c0_8 = arith.constant 0 : index
    %c0_9 = arith.constant 0 : index
    %15 = vector.load %arg4[%c0_8, %c0_9] : memref<128x128xbf16, #tpu.memory_space<vmem>>, vector<128x128xbf16>
    %cst_10 = arith.constant dense<0.000000e+00> : vector<8x128xf32>
    %16 = tpu.matmul %14, %15, %cst_10 {dimension_numbers = #tpu.dot_dimension_numbers<[1], [0], [0], [1], [0, 0, 1, 1], [], []>} : vector<8x128xbf16>, vector<128x128xbf16>, vector<8x128xf32> -> vector<8x128xf32>
    %c0_11 = arith.constant 0 : index
    %c0_12 = arith.constant 0 : index
    %17 = vector.load %arg5[%c0_11, %c0_12] : memref<1x128xf32, #tpu.memory_space<vmem>>, vector<1x128xf32>
    %18 = vector.broadcast %17 : vector<1x128xf32> to vector<8x128xf32>
    %19 = arith.addf %16, %18 : vector<8x128xf32>
    %c0_13 = arith.constant 0 : index
    %c0_14 = arith.constant 0 : index
    %20 = vector.load %arg6[%c0_13, %c0_14] : memref<8x128xf32, #tpu.memory_space<vmem>>, vector<8x128xf32>
    tpu.vector_store %arg6[%c0_13, %c0_14], %19 {strides = array<i32>} : memref<8x128xf32, #tpu.memory_space<vmem>>, vector<8x128xf32>,
    return
  }
  func.func @transform_0(%arg0: i32) -> (i32, i32) {
    %c0_i32 = arith.constant 0 : i32
    %c0_i32_0 = arith.constant 0 : i32
    return %arg0, %c0_i32 : i32, i32
  }
  func.func @transform_1(%arg0: i32) -> (i32, i32) {
    %c0_i32 = arith.constant 0 : i32
    %c0_i32_0 = arith.constant 0 : i32
    %c0_i32_1 = arith.constant 0 : i32
    return %c0_i32, %c0_i32_0 : i32, i32
  }
  func.func @transform_2(%arg0: i32) -> (i32, i32) {
    %c0_i32 = arith.constant 0 : i32
    %c0_i32_0 = arith.constant 0 : i32
    %c0_i32_1 = arith.constant 0 : i32
    return %c0_i32, %c0_i32_0 : i32, i32
  }
  func.func @transform_3(%arg0: i32) -> (i32, i32) {
    %c0_i32 = arith.constant 0 : i32
    %c0_i32_0 = arith.constant 0 : i32
    %c0_i32_1 = arith.constant 0 : i32
    return %c0_i32, %c0_i32_0 : i32, i32
  }
  func.func @transform_4(%arg0: i32) -> (i32, i32) {
    %c0_i32 = arith.constant 0 : i32
    %c0_i32_0 = arith.constant 0 : i32
    %c0_i32_1 = arith.constant 0 : i32
    return %c0_i32, %c0_i32_0 : i32, i32
  }
  func.func @transform_5(%arg0: i32) -> (i32, i32) {
    %c0_i32 = arith.constant 0 : i32
    %c0_i32_0 = arith.constant 0 : i32
    return %arg0, %c0_i32 : i32, i32
  }
}

module attributes {stable_mosaic.version = 11 : i64} {
  func.func @_ffn_kernel_resident(%arg0: i32, %arg1: memref<8x128xbf16, #tpu.memory_space<vmem>>, %arg2: memref<128x128xbf16, #tpu.memory_space<vmem>>, %arg3: memref<1x128xf32, #tpu.memory_space<vmem>>, %arg4: memref<128x128xbf16, #tpu.memory_space<vmem>>, %arg5: memref<1x128xf32, #tpu.memory_space<vmem>>, %arg6: memref<8x128xf32, #tpu.memory_space<vmem>>) attributes {dimension_semantics = [#tpu.dimension_semantics<parallel>], iteration_bounds = array<i64: 2>, scalar_prefetch = 0 : i64, scratch_operands = 0 : i64, tpu.core_type = #tpu.core_type<tc>, window_params = [{transform_indices = @transform_0, window_bounds = array<i64: 8, 128>}, {pipeline_mode = #tpu.pipeline_mode<synchronous>, transform_indices = @transform_1, window_bounds = array<i64: 128, 128>}, {pipeline_mode = #tpu.pipeline_mode<synchronous>, transform_indices = @transform_2, window_bounds = array<i64: 1, 128>}, {pipeline_mode = #tpu.pipeline_mode<synchronous>, transform_indices = @transform_3, window_bounds = array<i64: 128, 128>}, {pipeline_mode = #tpu.pipeline_mode<synchronous>, transform_indices = @transform_4, window_bounds = array<i64: 1, 128>}, {transform_indices = @transform_5, window_bounds = array<i64: 8, 128>}]} {
    %c0 = arith.constant 0 : index
    %c0_0 = arith.constant 0 : index
    %0 = vector.load %arg1[%c0, %c0_0] : memref<8x128xbf16, #tpu.memory_space<vmem>>, vector<8x128xbf16>
    %c0_1 = arith.constant 0 : index
    %c0_2 = arith.constant 0 : index
    %1 = vector.load %arg2[%c0_1, %c0_2] : memref<128x128xbf16, #tpu.memory_space<vmem>>, vector<128x128xbf16>
    %cst = arith.constant dense<0.000000e+00> : vector<8x128xf32>
    %2 = tpu.matmul %0, %1, %cst {dimension_numbers = #tpu.dot_dimension_numbers<[1], [0], [0], [1], [0, 0, 1, 1], [], []>} : vector<8x128xbf16>, vector<128x128xbf16>, vector<8x128xf32> -> vector<8x128xf32>
    %c0_3 = arith.constant 0 : index
    %c0_4 = arith.constant 0 : index
    %3 = vector.load %arg3[%c0_3, %c0_4] : memref<1x128xf32, #tpu.memory_space<vmem>>, vector<1x128xf32>
    %4 = vector.broadcast %3 : vector<1x128xf32> to vector<8x128xf32>
    %5 = arith.addf %2, %4 : vector<8x128xf32>
    %cst_5 = arith.constant 5.000000e-01 : f32
    %6 = vector.broadcast %cst_5 : f32 to vector<8x128xf32>
    %7 = arith.mulf %6, %5 : vector<8x128xf32>
    %cst_6 = arith.constant 0.707106769 : f32
    %8 = vector.broadcast %cst_6 : f32 to vector<8x128xf32>
    %9 = arith.mulf %5, %8 : vector<8x128xf32>
    %10 = math.erf %9 : vector<8x128xf32>
    %cst_7 = arith.constant 1.000000e+00 : f32
    %11 = vector.broadcast %cst_7 : f32 to vector<8x128xf32>
    %12 = arith.addf %11, %10 : vector<8x128xf32>
    %13 = arith.mulf %7, %12 : vector<8x128xf32>
    %14 = arith.truncf %13 : vector<8x128xf32> to vector<8x128xbf16>
    %c0_8 = arith.constant 0 : index
    %c0_9 = arith.constant 0 : index
    %15 = vector.load %arg4[%c0_8, %c0_9] : memref<128x128xbf16, #tpu.memory_space<vmem>>, vector<128x128xbf16>
    %cst_10 = arith.constant dense<0.000000e+00> : vector<8x128xf32>
    %16 = tpu.matmul %14, %15, %cst_10 {dimension_numbers = #tpu.dot_dimension_numbers<[1], [0], [0], [1], [0, 0, 1, 1], [], []>} : vector<8x128xbf16>, vector<128x128xbf16>, vector<8x128xf32> -> vector<8x128xf32>
    %c0_11 = arith.constant 0 : index
    %c0_12 = arith.constant 0 : index
    %17 = vector.load %arg5[%c0_11, %c0_12] : memref<1x128xf32, #tpu.memory_space<vmem>>, vector<1x128xf32>
    %18 = vector.broadcast %17 : vector<1x128xf32> to vector<8x128xf32>
    %19 = arith.addf %16, %18 : vector<8x128xf32>
    %c0_13 = arith.constant 0 : index
    %c0_14 = arith.constant 0 : index
    %20 = vector.load %arg6[%c0_13, %c0_14] : memref<8x128xf32, #tpu.memory_space<vmem>>, vector<8x128xf32>
    tpu.vector_store %arg6[%c0_13, %c0_14], %19 {strides = array<i32>} : memref<8x128xf32, #tpu.memory_space<vmem>>, vector<8x128xf32>,
    return
  }
  func.func @transform_0(%arg0: i32) -> (i32, i32) {
    %c0_i32 = arith.constant 0 : i32
    %c0_i32_0 = arith.constant 0 : i32
    return %arg0, %c0_i32 : i32, i32
  }
  func.func @transform_1(%arg0: i32) -> (i32, i32) {
    %c0_i32 = arith.constant 0 : i32
    %c0_i32_0 = arith.constant 0 : i32
    %c0_i32_1 = arith.constant 0 : i32
    return %c0_i32, %c0_i32_0 : i32, i32
  }
  func.func @transform_2(%arg0: i32) -> (i32, i32) {
    %c0_i32 = arith.constant 0 : i32
    %c0_i32_0 = arith.constant 0 : i32
    %c0_i32_1 = arith.constant 0 : i32
    return %c0_i32, %c0_i32_0 : i32, i32
  }
  func.func @transform_3(%arg0: i32) -> (i32, i32) {
    %c0_i32 = arith.constant 0 : i32
    %c0_i32_0 = arith.constant 0 : i32
    %c0_i32_1 = arith.constant 0 : i32
    return %c0_i32, %c0_i32_0 : i32, i32
  }
  func.func @transform_4(%arg0: i32) -> (i32, i32) {
    %c0_i32 = arith.constant 0 : i32
    %c0_i32_0 = arith.constant 0 : i32
    %c0_i32_1 = arith.constant 0 : i32
    return %c0_i32, %c0_i32_0 : i32, i32
  }
  func.func @transform_5(%arg0: i32) -> (i32, i32) {
    %c0_i32 = arith.constant 0 : i32
    %c0_i32_0 = arith.constant 0 : i32
    return %arg0, %c0_i32 : i32, i32
  }
}

</mosaic_0001>

<bundles_post_ra>
// kernel: tpu_custom_call.1
= control target key start
LH: loop header
LB: loop body
LE: loop exit
PB: predicated region body
PF: predicated region fallthrough
CT: control target
= control target key end

     0   :  { %10 = vsyncpa [#allocation3], 0  ;;  %s1219_s0 = inlined_call_operand.hbm [shape: bf16[16,128], index: 0, kind: input, shape index: {}]   ;;  %s1220_s1 = inlined_call_operand.hbm [shape: bf16[128,128], index: 1, kind: input, shape index: {}]   ;;  %s1221_s2 = inlined_call_operand.vmem [shape: f32[1,128], index: 2, kind: input, shape index: {}]   ;;  %s1222_s3 = inlined_call_operand.hbm [shape: bf16[128,128], index: 3, kind: input, shape index: {}]   ;;  %s1223_s4 = inlined_call_operand.vmem [shape: f32[1,128], index: 4, kind: input, shape index: {}]   ;;  %s1224_s5 = inlined_call_operand.hbm [shape: f32[16,128], index: 5, kind: output, shape index: {}]  }
   0x1   :  { %12 = vsyncpa [#allocation3 + $0x1], 0 }
   0x2   :  { %13 = vsyncpa [#allocation6], 0 }
   0x3   :  { %14 = vsyncpa [#allocation4], 0 }
   0x4   :  { %16 = vsyncpa [#allocation4 + $0x1], 0  ;;  %s980_s18 = smov 0   ;;  %s982_s19 = smov 0  }
   0x5   :  { %s984_s20 = smov 0   ;;  %s986_s21 = smov 0  }
   0x6 LB: > { %s1001_s22 = sadd.s32 4294967295, %s940_s21   ;;  %s603_s23 = sadd.s32 4294967294, %s940_s21   ;;  %s940_s21 = sphi %s986_s21, %s1244_s21   ;;  %s936_s20 = sphi %s984_s20, %s1243_s20   ;;  %s932_s19 = sphi %s982_s19, %s1242_s19   ;;  %s928_s18 = sphi %s980_s18, %s1241_s18  }
   0x7   : > { %p42_p0 = scmp.ne.s32.totalorder %s932_s19, %s928_s18  ;;  %p1225_p1 = scmp.eq.s32.totalorder %s1001_s22, 0 }
   0x8   : > { %p156_p3 = scmp.eq.s32.totalorder %s603_s23, 1  ;;  %p604_p5 = scmp.ge.s32.totalorder %s940_s21, 1 }
   0x9   : > { %p1010_p4 = por %p1225_p1, %p42_p0  ;;  %p163_p7 = scmp.lt.s32.totalorder %s940_s21, 3 }
   0xa   : > { %p1015_p6 = por %p156_p3, %p42_p0  ;;  %s942_s27 = smov [#allocation5]  }
   0xb   : > { %s1228_s24 = scalar_select %p1010_p4, 1, 0 }
   0xc   : > { %s1229_s25 = scalar_select %p1015_p6, 1, 0 }
   0xd   : > { %p1020_p8 = pnand %p604_p5, %p163_p7  ;;  %s175_s28 = sshll.u32 %s942_s27, 4  ;;  %s1024_s28 = int_to_ptr.vmem [resolvable:$true] %s175_s28 }
   0xe   : > { %s943_s30 = smov [#allocation7]   ;;  %s784_s9 = scalar_lea.hbm %s1220_s1, 1024 }
   0xf   : > { %p707_p9 = pneg %p1020_p8  ;;  %s191_s6 = sshll.u32 %s943_s30, 4  ;;  %s1035_s6 = int_to_ptr.vmem [resolvable:$true] %s191_s6 }
  0x10   : > { %p785_p12 = scmp.ne.s32.totalorder %s1220_s1, %s784_s9  ;;  %p791_p5 = scmp.lt.u32.totalorder %s784_s9, %s1220_s1 }
  0x11   : > { %p1031_p11 = pnand %p707_p9, %p1225_p1 }
  0x13   : > { %p786_p13 = pneg %p1031_p11 }
  0x15   : > { %p787_p0 = pnand %p786_p13, %p785_p12 }
  0x17   : > { %p788_p3 = pneg %p787_p0 }
  0x19   : > { %p793_p7 = pnand %p791_p5, %p788_p3 }
  0x1b   : > { %796 = shalt.err (!%p793_p7)
}
  0x1c   : > { %s797_s14 = scalar_lea.vmem %s1024_s28, 1024  ;;  %p805_p2 = scmp.lt.s32.totalorder %s1024_s28, %s1024_s28 }
  0x1d   : > { %p798_p9 = scmp.ne.s32.totalorder %s1024_s28, %s797_s14  ;;  %p806_p12 = scmp.lt.s32.totalorder %s797_s14, %s797_s14 }
  0x1f   : > { %p800_p10 = pnand %p798_p9, %p786_p13  ;;  %p807_p0 = por %p806_p12, %p805_p2 }
  0x21   : > { %p801_p1 = pneg %p800_p10 }
  0x23   : > { %p808_p6 = pnand %p807_p0, %p801_p1 }
  0x25   : > { %811 = shalt.err (!%p808_p6)
}
  0x26   : > { %s944_s15 = smov 64   ;;  %s945_s16 = smov 4  }
  0x27   : > { %710 = dma.hbm_to_vmem [thread:$0]  (!%p1031_p11), %s1220_s1, 1024, %s1024_s28, [#allocation6], %s944_s15, %s944_s15, %s945_s16  }
  0x28   : > { %s812_s7 = scalar_lea.hbm %s1222_s3, 1024 }
  0x29   : > { %p813_p2 = scmp.ne.s32.totalorder %s1222_s3, %s812_s7  ;;  %p819_p10 = scmp.lt.u32.totalorder %s812_s7, %s1222_s3 }
  0x2b   : > { %p815_p1 = pnand %p813_p2, %p786_p13 }
  0x2d   : > { %p816_p6 = pneg %p815_p1 }
  0x2f   : > { %p821_p3 = pnand %p819_p10, %p816_p6 }
  0x31   : > { %824 = shalt.err (!%p821_p3)
}
  0x32   : > { %s825_s28 = scalar_lea.vmem %s1035_s6, 1024  ;;  %p833_p12 = scmp.lt.s32.totalorder %s1035_s6, %s1035_s6 }
  0x33   : > { %p826_p5 = scmp.ne.s32.totalorder %s1035_s6, %s825_s28  ;;  %p834_p0 = scmp.lt.s32.totalorder %s825_s28, %s825_s28 }
  0x35   : > { %p828_p7 = pnand %p826_p5, %p786_p13  ;;  %p835_p2 = por %p834_p0, %p833_p12 }
  0x37   : > { %p829_p9 = pneg %p828_p7 }
  0x39   : > { %p836_p1 = pnand %p835_p2, %p829_p9 }
  0x3b   : > { %839 = shalt.err (!%p836_p1)
}
  0x3c   : > { %713 = dma.hbm_to_vmem [thread:$0]  (!%p1031_p11), %s1222_s3, 1024, %s1035_s6, [#allocation6], %s944_s15, %s944_s15, %s945_s16  }
  0x3d   : > { %s1090_s14 = sadd.s32 1, %s940_s21   ;;  %s29_s29 = sadd.s32 1, %s936_s20 }
  0x3e   : > { %s26_s17 = ssub.s32 %s940_s21, %s1090_s14  ;;  %p36_p13 = scmp.ne.s32.totalorder %s936_s20, %s932_s19 }
  0x3f   : > { %p27_p6 = scmp.eq.s32.totalorder %s26_s17, 0  ;;  %p37_p10 = scmp.eq.s32.totalorder %s940_s21, 0 }
  0x40   : > { %p1232_p3 = scmp.eq.s32.totalorder %s1001_s22, 1  ;;  %p724_p7 = scmp.lt.s32.totalorder %s940_s21, 2 }
  0x41   : > { %s1106_s27 = scalar_select %p27_p6, %s936_s20, %s29_s29  }
  0x42   : > { %p1100_p5 = por %p1232_p3, %p36_p13  ;;  %p38_p9 = por %p37_p10, %p36_p13 }
  0x43   : > { %s208_s30 = sand.u32 1, %s936_s20   ;;  %s609_s6 = sshll.u32 %s940_s21, 6 }
  0x44   : > { %s1233_s23 = scalar_select %p1100_p5, 1, 0 }
  0x45   : > { %s608_s7 = sshll.u32 %s208_s30, 2  ;;  %s1113_s8 = scalar_lea.hbm %s1219_s0, %s609_s6 }
  0x46   : > { %s212_s9 = scalar_lea.vmem [#allocation2], %s608_s7  ;;  %p1117_p11 = pnand %p724_p7, %p38_p9 }
  0x47   : > { %s219_s10 = sshll.u32 %s212_s9, 4  ;;  %s209_s28 = scalar_lea.sflag [#allocation3], %s208_s30  ;;  %s1115_s10 = int_to_ptr.vmem [resolvable:$true] %s219_s10 }
  0x48   : > { %s840_s12 = scalar_lea.hbm %s1113_s8, 64  ;;  %p842_p0 = pneg %p1117_p11 }
  0x49   : > { %p841_p12 = scmp.ne.s32.totalorder %s1113_s8, %s840_s12  ;;  %s845_s17 = scalar_lea.hbm %s1219_s0, 128 }
  0x4a   : > { %p846_p13 = scmp.lt.u32.totalorder %s1113_s8, %s1219_s0  ;;  %p847_p6 = scmp.lt.u32.totalorder %s845_s17, %s840_s12 }
  0x4b   : > { %p843_p2 = pnand %p842_p0, %p841_p12  ;;  %p849_p3 = scmp.lt.u32.totalorder %s840_s12, %s1113_s8 }
  0x4c   : > { %p848_p10 = por %p847_p6, %p846_p13 }
  0x4d   : > { %p844_p1 = pneg %p843_p2 }
  0x4e   : > { %p850_p7 = por %p849_p3, %p848_p10 }
  0x50   : > { %p851_p9 = pnand %p850_p7, %p844_p1 }
  0x52   : > { %854 = shalt.err (!%p851_p9)
}
  0x53   : > { %s855_s30 = scalar_lea.vmem %s1115_s10, 64  ;;  %s946_s15 = smov [#allocation2]  }
  0x54   : > { %p856_p12 = scmp.ne.s32.totalorder %s1115_s10, %s855_s30  ;;  %s860_s16 = sshll.u32 %s946_s15, 4  ;;  %s861_s16 = int_to_ptr.vmem [resolvable:$false] %s860_s16 }
  0x55   : > { %s862_s9 = scalar_lea.vmem %s861_s16, 128  ;;  %p863_p4 = scmp.lt.s32.totalorder %s1115_s10, %s861_s16 }
  0x56   : > { %p858_p2 = pnand %p856_p12, %p842_p0  ;;  %p864_p13 = scmp.lt.s32.totalorder %s862_s9, %s855_s30 }
  0x58   : > { %p859_p5 = pneg %p858_p2  ;;  %p865_p6 = por %p864_p13, %p863_p4 }
  0x5a   : > { %p866_p10 = pnand %p865_p6, %p859_p5 }
  0x5c   : > { %869 = shalt.err (!%p866_p10)
}
  0x5d   : > { %717 = dma.hbm_to_vmem [thread:$0]  (!%p1117_p11), %s1113_s8, 64, %s1115_s10, %s209_s28  }
  0x5e   : > { %228 = sbr.rel (%p1020_p8) target bundleno = 600 (0x258), region = 40  ;;  %s1149_s12 = sand.u32 (!%p1020_p8), 1, %s932_s19  }
  0x5f   : > { %s611_s13 = sshll.u32 (!%p1020_p8), %s1149_s12, 2  ;;  %s231_s29 = scalar_lea.sflag (!%p1020_p8), [#allocation3], %s1149_s12 }
  0x60   : > { %s1153_s17 = scalar_lea.vmem (!%p1020_p8), [#allocation2], %s611_s13  ;;  %p1235_p4 = scmp.ne.s32.totalorder (!%p1020_p8), %s1228_s24, 0 }
  0x65   : > { %915 = dma.done.wait (%p1235_p4), %s231_s29, 64  }
  0x66   : > { %917 = vsyncadd (%p1235_p4), %s231_s29, 4294967232  ;;  %p1236_p5 = scmp.eq.s32.totalorder %s1001_s22, 0 }
  0x68   : > { %919 = dma.done.wait (%p1236_p5), [#allocation6], 2048   ;;  %p1237_p8 = pmov %p1236_p5 }
  0x69   : > { %v947_v0 = vmov 0.0   ;;  %vm948_vm0 = vmmov 0   ;;  %v766_v1 = vld [vmem:[#allocation5] sm:$0xff]   ;;  %v767_v2 = vld [vmem:[#allocation5 + $0x8] sm:$0xff]   ;;  %v768_v3 = vld [vmem:[#allocation5 + $0x10] sm:$0xff]   ;;  %s614_s8 = sshll.u32 %s1149_s12, 3 }
  0x6a   : > { %921 = vsyncadd (%p1237_p8), [#allocation6], 4294965248  ;;  %655 = vmatprep.subr.bf16.mxu0 %v947_v0  ;;  %671 = vmatprep.mubr.msk.bf16.mxu0 %vm948_vm0, %v947_v0  ;;  %v774_v4 = vld [vmem:[#allocation7] sm:$0xff]   ;;  %v769_v5 = vld [vmem:[#allocation5 + $0x18] sm:$0xff]   ;;  %s634_s28 = sshll.u32 %s1001_s22, 7  ;;  %s268_s7 = scalar_lea.vmem [#allocation8], %s614_s8 }
  0x6b   : > { %675 = vmatprep.subr.bf16.mxu1 %v947_v0  ;;  %691 = vmatprep.mubr.msk.bf16.mxu1 %vm948_vm0, %v947_v0  ;;  %v775_v6 = vld [vmem:[#allocation7 + $0x8] sm:$0xff]   ;;  %v770_v7 = vld [vmem:[#allocation5 + $0x20] sm:$0xff]   ;;  %v776_v8 = vld [vmem:[#allocation7 + $0x10] sm:$0xff]   ;;  %s514_s6 = sshll.u32 %s268_s7, 4  ;;  %s1175_s16 = scalar_lea.hbm %s1224_s5, %s634_s28  ;;  %s1177_s6 = int_to_ptr.vmem [resolvable:$true] %s514_s6 }
  0x6c   : > { %656 = vmatpush3.bf16.msra.mxu0 %v766_v1  ;;  %676 = vmatpush3.bf16.msra.mxu1 %v774_v4  ;;  %v771_v9 = vld [vmem:[#allocation5 + $0x28] sm:$0xff]   ;;  %v772_v10 = vld [vmem:[#allocation5 + $0x30] sm:$0xff]   ;;  %v773_v11 = vld [vmem:[#allocation5 + $0x38] sm:$0xff]   ;;  %s501_s9 = scalar_lea.sflag [#allocation4], %s1149_s12  ;;  %s870_s22 = scalar_lea.vmem %s1177_s6, 128 }
  0x6d   : > { %657 = vmatprep.subr.bf16.mxu0 %v947_v0  ;;  %677 = vmatprep.subr.bf16.mxu1 %v947_v0  ;;  %v270_v12 = vld [vmem:[%s1153_s17] sm:$0xf]  ;;  %v778_v14 = vld [vmem:[#allocation7 + $0x20] sm:$0xff]   ;;  %v779_v15 = vld [vmem:[#allocation7 + $0x28] sm:$0xff]   ;;  %p871_p11 = scmp.ne.s32.totalorder %s1177_s6, %s870_s22  ;;  %p1238_p0 = scmp.ne.s32.totalorder %s1233_s23, 0 }
  0x6e   : > { %v777_v13 = vld [vmem:[#allocation7 + $0x18] sm:$0xff]   ;;  %v780_v16 = vld [vmem:[#allocation7 + $0x30] sm:$0xff]   ;;  %s949_s13 = smov [#allocation8]  }
  0x6f   : > { %v781_v17 = vld [vmem:[#allocation7 + $0x38] sm:$0xff]   ;;  %p872_p1 = pnand %p871_p11, %p1238_p0  ;;  %s874_s29 = sshll.u32 %s949_s13, 4  ;;  %s875_s29 = int_to_ptr.vmem [resolvable:$false] %s874_s29 }
  0x70   : > { %658 = vmatpush3.bf16.msra.mxu0 %v767_v2  ;;  %678 = vmatpush3.bf16.msra.mxu1 %v775_v6  ;;  %v615_v18 = vld [vmem:[%s1221_s2] ss:$0 sm:$0xff]  ;;  %s876_s17 = scalar_lea.vmem %s875_s29, 256  ;;  %p877_p7 = scmp.lt.s32.totalorder %s1177_s6, %s875_s29 }
  0x71   : > { %659 = vmatprep.subr.bf16.mxu0 %v947_v0  ;;  %679 = vmatprep.subr.bf16.mxu1 %v947_v0  ;;  %v624_v30 = vld [vmem:[%s1223_s4] ss:$0 sm:$0xff]  ;;  %p873_p3 = pneg %p872_p1  ;;  %p878_p9 = scmp.lt.s32.totalorder %s876_s17, %s870_s22 }
  0x73   : > { %p879_p12 = por %p878_p9, %p877_p7 }
  0x74   : > { %660 = vmatpush3.bf16.msra.mxu0 %v768_v3  ;;  %680 = vmatpush3.bf16.msra.mxu1 %v776_v8 }
  0x75   : > { %661 = vmatprep.subr.bf16.mxu0 %v947_v0  ;;  %681 = vmatprep.subr.bf16.mxu1 %v947_v0  ;;  %p880_p2 = pnand %p879_p12, %p873_p3 }
  0x78   : > { %662 = vmatpush3.bf16.msra.mxu0 %v769_v5  ;;  %682 = vmatpush3.bf16.msra.mxu1 %v777_v13 }
  0x79   : > { %663 = vmatprep.subr.bf16.mxu0 %v947_v0  ;;  %683 = vmatprep.subr.bf16.mxu1 %v947_v0 }
  0x7c   : > { %664 = vmatpush3.bf16.msra.mxu0 %v770_v7  ;;  %684 = vmatpush3.bf16.msra.mxu1 %v778_v14 }
  0x7d   : > { %665 = vmatprep.subr.bf16.mxu0 %v947_v0  ;;  %685 = vmatprep.subr.bf16.mxu1 %v947_v0 }
  0x80   : > { %666 = vmatpush3.bf16.msra.mxu0 %v771_v9  ;;  %686 = vmatpush3.bf16.msra.mxu1 %v779_v15 }
  0x81   : > { %667 = vmatprep.subr.bf16.mxu0 %v947_v0  ;;  %687 = vmatprep.subr.bf16.mxu1 %v947_v0 }
  0x84   : > { %668 = vmatpush3.bf16.msra.mxu0 %v772_v10  ;;  %688 = vmatpush3.bf16.msra.mxu1 %v780_v16 }
  0x85   : > { %669 = vmatprep.subr.bf16.mxu0 %v947_v0  ;;  %689 = vmatprep.subr.bf16.mxu1 %v947_v0 }
  0x88   : > { %670 = vmatpush3.bf16.msra.mxu0 %v773_v11  ;;  %690 = vmatpush3.bf16.msra.mxu1 %v781_v17 }
  0x8b   : > { %672 = vmatmul.mubr.bf16.vlgmr.msra.gmra.mrb[0].mxu0 %v270_v12 }
 0x15e   : > { %v376_v19 = vpop.f32.mrb[0].mxu0 }
 0x15f   : > { %v377_v20 = vadd.f32 %v615_v18, %v376_v19  ;;  %v673_v21 = vpop.f32.mrb[1].mxu0 }
 0x160   : > { %v379_v22 = vpop.f32.mrb[2].mxu0 }
 0x161   : > { %v383_v23 = vmul.f32 0.70710677, %v377_v20  ;;  %v674_v24 = vpop.f32.mrb[3].mxu0  ;;  %v382_v26 = vmul.f32 0.5, %v377_v20 }
 0x163   : > { %782 = verf.f32 %v383_v23 }
 0x16d   : > { %v783_v25 = vpop.eup %782 }
 0x16e   : > { %v385_v27 = vadd.f32 1.0, %v783_v25 }
 0x170   : > { %v386_v28 = vmul.f32 %v385_v27, %v382_v26 }
 0x172   : > { %v387_v29 = vpack.c.bf16 %v386_v28, %v386_v28 }
 0x174   : > { %692 = vmatmul.mubr.bf16.vlgmr.msra.gmra.mrb[0].mxu1 %v387_v29 }
 0x247   : > { %v493_v31 = vpop.f32.mrb[0].mxu1 }
 0x248   : > { %v494_v32 = vadd.f32 %v624_v30, %v493_v31  ;;  %v693_v33 = vpop.f32.mrb[1].mxu1 }
 0x249   : > { %v496_v34 = vpop.f32.mrb[2].mxu1 }
 0x24a   : > { %499 = vst [vmem:[%s268_s7] sm:$0xff] %v494_v32  ;;  %v694_v35 = vpop.f32.mrb[3].mxu1 }
 0x24b   : > { %883 = shalt.err (!%p880_p2)
}
 0x24c   : > { %s884_s12 = scalar_lea.hbm %s1175_s16, 128  ;;  %s888_s8 = scalar_lea.hbm %s1224_s5, 256 }
 0x24d   : > { %p885_p13 = scmp.ne.s32.totalorder %s1175_s16, %s884_s12  ;;  %p889_p4 = scmp.lt.u32.totalorder %s1175_s16, %s1224_s5 }
 0x24e   : > { %p890_p5 = scmp.lt.u32.totalorder %s888_s8, %s884_s12  ;;  %p892_p11 = scmp.lt.u32.totalorder %s884_s12, %s1175_s16 }
 0x24f   : > { %p886_p6 = pnand %p885_p13, %p1238_p0 }
 0x250   : > { %p891_p8 = por %p890_p5, %p889_p4 }
 0x251   : > { %p887_p10 = pneg %p886_p6 }
 0x252   : > { %p893_p1 = por %p892_p11, %p891_p8 }
 0x254   : > { %p894_p3 = pnand %p893_p1, %p887_p10 }
 0x256   : > { %897 = shalt.err (!%p894_p3)
}
 0x257   : > { %705 = dma.vmem_to_hbm [thread:$0]  (%p1238_p0), %s1177_s6, 128, %s1175_s16, %s501_s9  }
 0x258 PF: > { %s526_s28 = sand.u32 1, %s928_s18   ;;  %p1239_p7 = scmp.ne.s32.totalorder %s1229_s25, 0 }
 0x259   : > { %p1240_p9 = scmp.ge.s32.totalorder %s940_s21, 2  ;;  %s527_s7 = scalar_lea.sflag [#allocation4], %s526_s28 }
 0x25b   : > { %p719_p12 = pnand %p1240_p9, %p1239_p7 }
 0x25d   : > { %923 = dma.done.wait (!%p719_p12), %s527_s7, 128  }
 0x25e   : > { %925 = vsyncadd (!%p719_p12), %s527_s7, 4294967168  ;;  %p19_p2 = scmp.ge.s32.totalorder %s1090_s14, 4   ;;  %s1241_s18 = smov %s932_s19 }
 0x25f   : > { %s1242_s19 = smov %s936_s20  ;;  %s1243_s20 = smov %s1106_s27 }
 0x260   : > { %s1244_s21 = smov %s1090_s14  ;;  %21 = sbr.rel (!%p19_p2) target bundleno = 6 (0x6), region = 93 }
 0x267   :  { %532 = vsyncpa [#allocation3], 1 }
 0x268   :  { %534 = vsyncpa [#allocation3 + $0x1], 1 }
 0x269   :  { %535 = vsyncpa [#allocation6], 1 }
 0x26a   :  { %536 = vsyncpa [#allocation4], 1 }
 0x26b   :  { %538 = vsyncpa [#allocation4 + $0x1], 1 }

// kernel: tpu_custom_call.1
= control target key start
LH: loop header
LB: loop body
LE: loop exit
PB: predicated region body
PF: predicated region fallthrough
CT: control target
= control target key end

     0   :  { %10 = vsyncpa [#allocation3], 0  ;;  %s1219_s0 = inlined_call_operand.hbm [shape: bf16[16,128], index: 0, kind: input, shape index: {}]   ;;  %s1220_s1 = inlined_call_operand.hbm [shape: bf16[128,128], index: 1, kind: input, shape index: {}]   ;;  %s1221_s2 = inlined_call_operand.vmem [shape: f32[1,128], index: 2, kind: input, shape index: {}]   ;;  %s1222_s3 = inlined_call_operand.hbm [shape: bf16[128,128], index: 3, kind: input, shape index: {}]   ;;  %s1223_s4 = inlined_call_operand.vmem [shape: f32[1,128], index: 4, kind: input, shape index: {}]   ;;  %s1224_s5 = inlined_call_operand.hbm [shape: f32[16,128], index: 5, kind: output, shape index: {}]  }
   0x1   :  { %12 = vsyncpa [#allocation3 + $0x1], 0 }
   0x2   :  { %13 = vsyncpa [#allocation6], 0 }
   0x3   :  { %14 = vsyncpa [#allocation4], 0 }
   0x4   :  { %16 = vsyncpa [#allocation4 + $0x1], 0  ;;  %s980_s18 = smov 0   ;;  %s982_s19 = smov 0  }
   0x5   :  { %s984_s20 = smov 0   ;;  %s986_s21 = smov 0  }
   0x6 LB: > { %s1001_s22 = sadd.s32 4294967295, %s940_s21   ;;  %s603_s23 = sadd.s32 4294967294, %s940_s21   ;;  %s940_s21 = sphi %s986_s21, %s1244_s21   ;;  %s936_s20 = sphi %s984_s20, %s1243_s20   ;;  %s932_s19 = sphi %s982_s19, %s1242_s19   ;;  %s928_s18 = sphi %s980_s18, %s1241_s18  }
   0x7   : > { %p42_p0 = scmp.ne.s32.totalorder %s932_s19, %s928_s18  ;;  %p1225_p1 = scmp.eq.s32.totalorder %s1001_s22, 0 }
   0x8   : > { %p156_p3 = scmp.eq.s32.totalorder %s603_s23, 1  ;;  %p604_p5 = scmp.ge.s32.totalorder %s940_s21, 1 }
   0x9   : > { %p1010_p4 = por %p1225_p1, %p42_p0  ;;  %p163_p7 = scmp.lt.s32.totalorder %s940_s21, 3 }
   0xa   : > { %p1015_p6 = por %p156_p3, %p42_p0  ;;  %s942_s27 = smov [#allocation5]  }
   0xb   : > { %s1228_s24 = scalar_select %p1010_p4, 1, 0 }
   0xc   : > { %s1229_s25 = scalar_select %p1015_p6, 1, 0 }
   0xd   : > { %p1020_p8 = pnand %p604_p5, %p163_p7  ;;  %s175_s28 = sshll.u32 %s942_s27, 4  ;;  %s1024_s28 = int_to_ptr.vmem [resolvable:$true] %s175_s28 }
   0xe   : > { %s943_s30 = smov [#allocation7]   ;;  %s784_s9 = scalar_lea.hbm %s1220_s1, 1024 }
   0xf   : > { %p707_p9 = pneg %p1020_p8  ;;  %s191_s6 = sshll.u32 %s943_s30, 4  ;;  %s1035_s6 = int_to_ptr.vmem [resolvable:$true] %s191_s6 }
  0x10   : > { %p785_p12 = scmp.ne.s32.totalorder %s1220_s1, %s784_s9  ;;  %p791_p5 = scmp.lt.u32.totalorder %s784_s9, %s1220_s1 }
  0x11   : > { %p1031_p11 = pnand %p707_p9, %p1225_p1 }
  0x13   : > { %p786_p13 = pneg %p1031_p11 }
  0x15   : > { %p787_p0 = pnand %p786_p13, %p785_p12 }
  0x17   : > { %p788_p3 = pneg %p787_p0 }
  0x19   : > { %p793_p7 = pnand %p791_p5, %p788_p3 }
  0x1b   : > { %796 = shalt.err (!%p793_p7)
}
  0x1c   : > { %s797_s14 = scalar_lea.vmem %s1024_s28, 1024  ;;  %p805_p2 = scmp.lt.s32.totalorder %s1024_s28, %s1024_s28 }
  0x1d   : > { %p798_p9 = scmp.ne.s32.totalorder %s1024_s28, %s797_s14  ;;  %p806_p12 = scmp.lt.s32.totalorder %s797_s14, %s797_s14 }
  0x1f   : > { %p800_p10 = pnand %p798_p9, %p786_p13  ;;  %p807_p0 = por %p806_p12, %p805_p2 }
  0x21   : > { %p801_p1 = pneg %p800_p10 }
  0x23   : > { %p808_p6 = pnand %p807_p0, %p801_p1 }
  0x25   : > { %811 = shalt.err (!%p808_p6)
}
  0x26   : > { %s944_s15 = smov 64   ;;  %s945_s16 = smov 4  }
  0x27   : > { %710 = dma.hbm_to_vmem [thread:$0]  (!%p1031_p11), %s1220_s1, 1024, %s1024_s28, [#allocation6], %s944_s15, %s944_s15, %s945_s16  }
  0x28   : > { %s812_s7 = scalar_lea.hbm %s1222_s3, 1024 }
  0x29   : > { %p813_p2 = scmp.ne.s32.totalorder %s1222_s3, %s812_s7  ;;  %p819_p10 = scmp.lt.u32.totalorder %s812_s7, %s1222_s3 }
  0x2b   : > { %p815_p1 = pnand %p813_p2, %p786_p13 }
  0x2d   : > { %p816_p6 = pneg %p815_p1 }
  0x2f   : > { %p821_p3 = pnand %p819_p10, %p816_p6 }
  0x31   : > { %824 = shalt.err (!%p821_p3)
}
  0x32   : > { %s825_s28 = scalar_lea.vmem %s1035_s6, 1024  ;;  %p833_p12 = scmp.lt.s32.totalorder %s1035_s6, %s1035_s6 }
  0x33   : > { %p826_p5 = scmp.ne.s32.totalorder %s1035_s6, %s825_s28  ;;  %p834_p0 = scmp.lt.s32.totalorder %s825_s28, %s825_s28 }
  0x35   : > { %p828_p7 = pnand %p826_p5, %p786_p13  ;;  %p835_p2 = por %p834_p0, %p833_p12 }
  0x37   : > { %p829_p9 = pneg %p828_p7 }
  0x39   : > { %p836_p1 = pnand %p835_p2, %p829_p9 }
  0x3b   : > { %839 = shalt.err (!%p836_p1)
}
  0x3c   : > { %713 = dma.hbm_to_vmem [thread:$0]  (!%p1031_p11), %s1222_s3, 1024, %s1035_s6, [#allocation6], %s944_s15, %s944_s15, %s945_s16  }
  0x3d   : > { %s1090_s14 = sadd.s32 1, %s940_s21   ;;  %s29_s29 = sadd.s32 1, %s936_s20 }
  0x3e   : > { %s26_s17 = ssub.s32 %s940_s21, %s1090_s14  ;;  %p36_p13 = scmp.ne.s32.totalorder %s936_s20, %s932_s19 }
  0x3f   : > { %p27_p6 = scmp.eq.s32.totalorder %s26_s17, 0  ;;  %p37_p10 = scmp.eq.s32.totalorder %s940_s21, 0 }
  0x40   : > { %p1232_p3 = scmp.eq.s32.totalorder %s1001_s22, 1  ;;  %p724_p7 = scmp.lt.s32.totalorder %s940_s21, 2 }
  0x41   : > { %s1106_s27 = scalar_select %p27_p6, %s936_s20, %s29_s29  }
  0x42   : > { %p1100_p5 = por %p1232_p3, %p36_p13  ;;  %p38_p9 = por %p37_p10, %p36_p13 }
  0x43   : > { %s208_s30 = sand.u32 1, %s936_s20   ;;  %s609_s6 = sshll.u32 %s940_s21, 6 }
  0x44   : > { %s1233_s23 = scalar_select %p1100_p5, 1, 0 }
  0x45   : > { %s608_s7 = sshll.u32 %s208_s30, 2  ;;  %s1113_s8 = scalar_lea.hbm %s1219_s0, %s609_s6 }
  0x46   : > { %s212_s9 = scalar_lea.vmem [#allocation2], %s608_s7  ;;  %p1117_p11 = pnand %p724_p7, %p38_p9 }
  0x47   : > { %s219_s10 = sshll.u32 %s212_s9, 4  ;;  %s209_s28 = scalar_lea.sflag [#allocation3], %s208_s30  ;;  %s1115_s10 = int_to_ptr.vmem [resolvable:$true] %s219_s10 }
  0x48   : > { %s840_s12 = scalar_lea.hbm %s1113_s8, 64  ;;  %p842_p0 = pneg %p1117_p11 }
  0x49   : > { %p841_p12 = scmp.ne.s32.totalorder %s1113_s8, %s840_s12  ;;  %s845_s17 = scalar_lea.hbm %s1219_s0, 128 }
  0x4a   : > { %p846_p13 = scmp.lt.u32.totalorder %s1113_s8, %s1219_s0  ;;  %p847_p6 = scmp.lt.u32.totalorder %s845_s17, %s840_s12 }
  0x4b   : > { %p843_p2 = pnand %p842_p0, %p841_p12  ;;  %p849_p3 = scmp.lt.u32.totalorder %s840_s12, %s1113_s8 }
  0x4c   : > { %p848_p10 = por %p847_p6, %p846_p13 }
  0x4d   : > { %p844_p1 = pneg %p843_p2 }
  0x4e   : > { %p850_p7 = por %p849_p3, %p848_p10 }
  0x50   : > { %p851_p9 = pnand %p850_p7, %p844_p1 }
  0x52   : > { %854 = shalt.err (!%p851_p9)
}
  0x53   : > { %s855_s30 = scalar_lea.vmem %s1115_s10, 64  ;;  %s946_s15 = smov [#allocation2]  }
  0x54   : > { %p856_p12 = scmp.ne.s32.totalorder %s1115_s10, %s855_s30  ;;  %s860_s16 = sshll.u32 %s946_s15, 4  ;;  %s861_s16 = int_to_ptr.vmem [resolvable:$false] %s860_s16 }
  0x55   : > { %s862_s9 = scalar_lea.vmem %s861_s16, 128  ;;  %p863_p4 = scmp.lt.s32.totalorder %s1115_s10, %s861_s16 }
  0x56   : > { %p858_p2 = pnand %p856_p12, %p842_p0  ;;  %p864_p13 = scmp.lt.s32.totalorder %s862_s9, %s855_s30 }
  0x58   : > { %p859_p5 = pneg %p858_p2  ;;  %p865_p6 = por %p864_p13, %p863_p4 }
  0x5a   : > { %p866_p10 = pnand %p865_p6, %p859_p5 }
  0x5c   : > { %869 = shalt.err (!%p866_p10)
}
  0x5d   : > { %717 = dma.hbm_to_vmem [thread:$0]  (!%p1117_p11), %s1113_s8, 64, %s1115_s10, %s209_s28  }
  0x5e   : > { %228 = sbr.rel (%p1020_p8) target bundleno = 600 (0x258), region = 40  ;;  %s1149_s12 = sand.u32 (!%p1020_p8), 1, %s932_s19  }
  0x5f   : > { %s611_s13 = sshll.u32 (!%p1020_p8), %s1149_s12, 2  ;;  %s231_s29 = scalar_lea.sflag (!%p1020_p8), [#allocation3], %s1149_s12 }
  0x60   : > { %s1153_s17 = scalar_lea.vmem (!%p1020_p8), [#allocation2], %s611_s13  ;;  %p1235_p4 = scmp.ne.s32.totalorder (!%p1020_p8), %s1228_s24, 0 }
  0x65   : > { %915 = dma.done.wait (%p1235_p4), %s231_s29, 64  }
  0x66   : > { %917 = vsyncadd (%p1235_p4), %s231_s29, 4294967232  ;;  %p1236_p5 = scmp.eq.s32.totalorder %s1001_s22, 0 }
  0x68   : > { %919 = dma.done.wait (%p1236_p5), [#allocation6], 2048   ;;  %p1237_p8 = pmov %p1236_p5 }
  0x69   : > { %v947_v0 = vmov 0.0   ;;  %vm948_vm0 = vmmov 0   ;;  %v766_v1 = vld [vmem:[#allocation5] sm:$0xff]   ;;  %v767_v2 = vld [vmem:[#allocation5 + $0x8] sm:$0xff]   ;;  %v768_v3 = vld [vmem:[#allocation5 + $0x10] sm:$0xff]   ;;  %s614_s8 = sshll.u32 %s1149_s12, 3 }
  0x6a   : > { %921 = vsyncadd (%p1237_p8), [#allocation6], 4294965248  ;;  %655 = vmatprep.subr.bf16.mxu0 %v947_v0  ;;  %671 = vmatprep.mubr.msk.bf16.mxu0 %vm948_vm0, %v947_v0  ;;  %v774_v4 = vld [vmem:[#allocation7] sm:$0xff]   ;;  %v769_v5 = vld [vmem:[#allocation5 + $0x18] sm:$0xff]   ;;  %s634_s28 = sshll.u32 %s1001_s22, 7  ;;  %s268_s7 = scalar_lea.vmem [#allocation8], %s614_s8 }
  0x6b   : > { %675 = vmatprep.subr.bf16.mxu1 %v947_v0  ;;  %691 = vmatprep.mubr.msk.bf16.mxu1 %vm948_vm0, %v947_v0  ;;  %v775_v6 = vld [vmem:[#allocation7 + $0x8] sm:$0xff]   ;;  %v770_v7 = vld [vmem:[#allocation5 + $0x20] sm:$0xff]   ;;  %v776_v8 = vld [vmem:[#allocation7 + $0x10] sm:$0xff]   ;;  %s514_s6 = sshll.u32 %s268_s7, 4  ;;  %s1175_s16 = scalar_lea.hbm %s1224_s5, %s634_s28  ;;  %s1177_s6 = int_to_ptr.vmem [resolvable:$true] %s514_s6 }
  0x6c   : > { %656 = vmatpush3.bf16.msra.mxu0 %v766_v1  ;;  %676 = vmatpush3.bf16.msra.mxu1 %v774_v4  ;;  %v771_v9 = vld [vmem:[#allocation5 + $0x28] sm:$0xff]   ;;  %v772_v10 = vld [vmem:[#allocation5 + $0x30] sm:$0xff]   ;;  %v773_v11 = vld [vmem:[#allocation5 + $0x38] sm:$0xff]   ;;  %s501_s9 = scalar_lea.sflag [#allocation4], %s1149_s12  ;;  %s870_s22 = scalar_lea.vmem %s1177_s6, 128 }
  0x6d   : > { %657 = vmatprep.subr.bf16.mxu0 %v947_v0  ;;  %677 = vmatprep.subr.bf16.mxu1 %v947_v0  ;;  %v270_v12 = vld [vmem:[%s1153_s17] sm:$0xf]  ;;  %v778_v14 = vld [vmem:[#allocation7 + $0x20] sm:$0xff]   ;;  %v779_v15 = vld [vmem:[#allocation7 + $0x28] sm:$0xff]   ;;  %p871_p11 = scmp.ne.s32.totalorder %s1177_s6, %s870_s22  ;;  %p1238_p0 = scmp.ne.s32.totalorder %s1233_s23, 0 }
  0x6e   : > { %v777_v13 = vld [vmem:[#allocation7 + $0x18] sm:$0xff]   ;;  %v780_v16 = vld [vmem:[#allocation7 + $0x30] sm:$0xff]   ;;  %s949_s13 = smov [#allocation8]  }
  0x6f   : > { %v781_v17 = vld [vmem:[#allocation7 + $0x38] sm:$0xff]   ;;  %p872_p1 = pnand %p871_p11, %p1238_p0  ;;  %s874_s29 = sshll.u32 %s949_s13, 4  ;;  %s875_s29 = int_to_ptr.vmem [resolvable:$false] %s874_s29 }
  0x70   : > { %658 = vmatpush3.bf16.msra.mxu0 %v767_v2  ;;  %678 = vmatpush3.bf16.msra.mxu1 %v775_v6  ;;  %v615_v18 = vld [vmem:[%s1221_s2] ss:$0 sm:$0xff]  ;;  %s876_s17 = scalar_lea.vmem %s875_s29, 256  ;;  %p877_p7 = scmp.lt.s32.totalorder %s1177_s6, %s875_s29 }
  0x71   : > { %659 = vmatprep.subr.bf16.mxu0 %v947_v0  ;;  %679 = vmatprep.subr.bf16.mxu1 %v947_v0  ;;  %v624_v30 = vld [vmem:[%s1223_s4] ss:$0 sm:$0xff]  ;;  %p873_p3 = pneg %p872_p1  ;;  %p878_p9 = scmp.lt.s32.totalorder %s876_s17, %s870_s22 }
  0x73   : > { %p879_p12 = por %p878_p9, %p877_p7 }
  0x74   : > { %660 = vmatpush3.bf16.msra.mxu0 %v768_v3  ;;  %680 = vmatpush3.bf16.msra.mxu1 %v776_v8 }
  0x75   : > { %661 = vmatprep.subr.bf16.mxu0 %v947_v0  ;;  %681 = vmatprep.subr.bf16.mxu1 %v947_v0  ;;  %p880_p2 = pnand %p879_p12, %p873_p3 }
  0x78   : > { %662 = vmatpush3.bf16.msra.mxu0 %v769_v5  ;;  %682 = vmatpush3.bf16.msra.mxu1 %v777_v13 }
  0x79   : > { %663 = vmatprep.subr.bf16.mxu0 %v947_v0  ;;  %683 = vmatprep.subr.bf16.mxu1 %v947_v0 }
  0x7c   : > { %664 = vmatpush3.bf16.msra.mxu0 %v770_v7  ;;  %684 = vmatpush3.bf16.msra.mxu1 %v778_v14 }
  0x7d   : > { %665 = vmatprep.subr.bf16.mxu0 %v947_v0  ;;  %685 = vmatprep.subr.bf16.mxu1 %v947_v0 }
  0x80   : > { %666 = vmatpush3.bf16.msra.mxu0 %v771_v9  ;;  %686 = vmatpush3.bf16.msra.mxu1 %v779_v15 }
  0x81   : > { %667 = vmatprep.subr.bf16.mxu0 %v947_v0  ;;  %687 = vmatprep.subr.bf16.mxu1 %v947_v0 }
  0x84   : > { %668 = vmatpush3.bf16.msra.mxu0 %v772_v10  ;;  %688 = vmatpush3.bf16.msra.mxu1 %v780_v16 }
  0x85   : > { %669 = vmatprep.subr.bf16.mxu0 %v947_v0  ;;  %689 = vmatprep.subr.bf16.mxu1 %v947_v0 }
  0x88   : > { %670 = vmatpush3.bf16.msra.mxu0 %v773_v11  ;;  %690 = vmatpush3.bf16.msra.mxu1 %v781_v17 }
  0x8b   : > { %672 = vmatmul.mubr.bf16.vlgmr.msra.gmra.mrb[0].mxu0 %v270_v12 }
 0x15e   : > { %v376_v19 = vpop.f32.mrb[0].mxu0 }
 0x15f   : > { %v377_v20 = vadd.f32 %v615_v18, %v376_v19  ;;  %v673_v21 = vpop.f32.mrb[1].mxu0 }
 0x160   : > { %v379_v22 = vpop.f32.mrb[2].mxu0 }
 0x161   : > { %v383_v23 = vmul.f32 0.70710677, %v377_v20  ;;  %v674_v24 = vpop.f32.mrb[3].mxu0  ;;  %v382_v26 = vmul.f32 0.5, %v377_v20 }
 0x163   : > { %782 = verf.f32 %v383_v23 }
 0x16d   : > { %v783_v25 = vpop.eup %782 }
 0x16e   : > { %v385_v27 = vadd.f32 1.0, %v783_v25 }
 0x170   : > { %v386_v28 = vmul.f32 %v385_v27, %v382_v26 }
 0x172   : > { %v387_v29 = vpack.c.bf16 %v386_v28, %v386_v28 }
 0x174   : > { %692 = vmatmul.mubr.bf16.vlgmr.msra.gmra.mrb[0].mxu1 %v387_v29 }
 0x247   : > { %v493_v31 = vpop.f32.mrb[0].mxu1 }
 0x248   : > { %v494_v32 = vadd.f32 %v624_v30, %v493_v31  ;;  %v693_v33 = vpop.f32.mrb[1].mxu1 }
 0x249   : > { %v496_v34 = vpop.f32.mrb[2].mxu1 }
 0x24a   : > { %499 = vst [vmem:[%s268_s7] sm:$0xff] %v494_v32  ;;  %v694_v35 = vpop.f32.mrb[3].mxu1 }
 0x24b   : > { %883 = shalt.err (!%p880_p2)
}
 0x24c   : > { %s884_s12 = scalar_lea.hbm %s1175_s16, 128  ;;  %s888_s8 = scalar_lea.hbm %s1224_s5, 256 }
 0x24d   : > { %p885_p13 = scmp.ne.s32.totalorder %s1175_s16, %s884_s12  ;;  %p889_p4 = scmp.lt.u32.totalorder %s1175_s16, %s1224_s5 }
 0x24e   : > { %p890_p5 = scmp.lt.u32.totalorder %s888_s8, %s884_s12  ;;  %p892_p11 = scmp.lt.u32.totalorder %s884_s12, %s1175_s16 }
 0x24f   : > { %p886_p6 = pnand %p885_p13, %p1238_p0 }
 0x250   : > { %p891_p8 = por %p890_p5, %p889_p4 }
 0x251   : > { %p887_p10 = pneg %p886_p6 }
 0x252   : > { %p893_p1 = por %p892_p11, %p891_p8 }
 0x254   : > { %p894_p3 = pnand %p893_p1, %p887_p10 }
 0x256   : > { %897 = shalt.err (!%p894_p3)
}
 0x257   : > { %705 = dma.vmem_to_hbm [thread:$0]  (%p1238_p0), %s1177_s6, 128, %s1175_s16, %s501_s9  }
 0x258 PF: > { %s526_s28 = sand.u32 1, %s928_s18   ;;  %p1239_p7 = scmp.ne.s32.totalorder %s1229_s25, 0 }
 0x259   : > { %p1240_p9 = scmp.ge.s32.totalorder %s940_s21, 2  ;;  %s527_s7 = scalar_lea.sflag [#allocation4], %s526_s28 }
 0x25b   : > { %p719_p12 = pnand %p1240_p9, %p1239_p7 }
 0x25d   : > { %923 = dma.done.wait (!%p719_p12), %s527_s7, 128  }
 0x25e   : > { %925 = vsyncadd (!%p719_p12), %s527_s7, 4294967168  ;;  %p19_p2 = scmp.ge.s32.totalorder %s1090_s14, 4   ;;  %s1241_s18 = smov %s932_s19 }
 0x25f   : > { %s1242_s19 = smov %s936_s20  ;;  %s1243_s20 = smov %s1106_s27 }
 0x260   : > { %s1244_s21 = smov %s1090_s14  ;;  %21 = sbr.rel (!%p19_p2) target bundleno = 6 (0x6), region = 93 }
 0x267   :  { %532 = vsyncpa [#allocation3], 1 }
 0x268   :  { %534 = vsyncpa [#allocation3 + $0x1], 1 }
 0x269   :  { %535 = vsyncpa [#allocation6], 1 }
 0x26a   :  { %536 = vsyncpa [#allocation4], 1 }
 0x26b   :  { %538 = vsyncpa [#allocation4 + $0x1], 1 }

</bundles_post_ra>
